<compile_context>
chip_gen: v6e
topology: v6e:2x2x1
jax: 0.10.0
libtpu: 0.0.40
codegen_flags: <defaults>
</compile_context>

<pallas_src>
import functools

import jax
import jax.numpy as jnp
from jax.experimental import pallas as pl
from jax.experimental.pallas import tpu as pltpu


def _round_up(v, m):
    return (v + m - 1) // m * m


def _cdiv(a, b):
    return -(-a // b)


def _pad2d(a, rows, cols, dtype):
    """Zero-pad `a` to (rows, cols) and cast; returns `a` untouched if already exact."""
    if a.shape == (rows, cols) and a.dtype == jnp.dtype(dtype):
        return a
    out = jnp.zeros((rows, cols), dtype)
    return out.at[: a.shape[0], : a.shape[1]].set(a.astype(dtype))


def _vmem_limit_bytes():
    try:
        cap = int(pltpu.get_tpu_info().vmem_capacity_bytes)
    except Exception:
        cap = 64 * 1024 * 1024                     # conservative (v7x-sized) fallback
    # ~75% of physical, capped at 100 MiB: v5e/v6e -> 96 MiB, v7x -> 48 MiB.
    return max(32 * 1024 * 1024, min(cap * 3 // 4, 100 * 1024 * 1024))


def mlp_kernel(x_ref, w1_ref, b1_ref, w2_ref, b2_ref, o_ref):
    # x_ref : (TM, Dp_in)      w1_ref: (Dp_in, Dp_hid)   b1_ref: (1, Dp_hid)
    # w2_ref: (Dp_hid, Dp_out) b2_ref: (1, Dp_out)       o_ref : (TM, Dp_out)
    z1 = jnp.dot(x_ref[...], w1_ref[...], preferred_element_type=jnp.float32)
    h = jnp.tanh(z1 + b1_ref[...])                 # == 2*sigmoid(alpha*Y1) - 1
    z2 = jnp.dot(h.astype(w2_ref.dtype), w2_ref[...],
                 preferred_element_type=jnp.float32)
    o_ref[...] = (0.5 * jnp.tanh(z2 + b2_ref[...]) + 0.5).astype(o_ref.dtype)


def mlp_forward(x, wih, who, *, alpha, epsilon, gamma, beta,
                tm_max=1024, mxu_dtype=jnp.bfloat16):
    n, d_in = x.shape
    d_hid = wih.shape[1]
    d_out = who.shape[1]
    assert wih.shape == (d_in, d_hid)
    assert who.shape == (d_hid, d_out)
    assert n >= 2, "unbiased variance (N-1) requires at least 2 samples"

    xf = x.astype(jnp.float32)
    wih_f = wih.astype(jnp.float32)
    who_f = who.astype(jnp.float32)

    # ---- batch statistics over the FULL batch (single pass over X) ----
    n_f = jnp.float32(n)
    s1 = jnp.sum(xf, axis=0)
    s2 = jnp.sum(xf * xf, axis=0)
    bmean = s1 / n_f
    bvar = jnp.maximum((s2 - n_f * bmean * bmean) / jnp.float32(n - 1), 0.0)
    shift = bmean / jnp.sqrt(bvar + jnp.float32(epsilon))       # precedence bug preserved
    bias_row = jnp.float32(beta) - jnp.float32(gamma) * shift   # X_n = gamma*X + bias_row

    # ---- fold gamma / bias / alpha / sigmoid->tanh rescale into weights + biases ----
    #   Y2 = sigmoid(alpha*Y1) = 0.5*tanh(X @ W1 + b1) + 0.5
    #   Y4 = sigmoid(alpha*Y3) = 0.5*tanh(h @ W2 + b2) + 0.5,  h = tanh(X @ W1 + b1)
    s = 0.5 * float(alpha)
    w1 = jnp.float32(s * float(gamma)) * wih_f
    b1 = jnp.float32(s) * (bias_row @ wih_f)
    w2 = jnp.float32(0.5 * s) * who_f
    b2 = jnp.float32(0.5 * s) * jnp.sum(who_f, axis=0)

    # ---- lane-dense padding targets (last dims -> multiples of 128) ----
    dp_in = _round_up(d_in, 128)
    dp_hid = _round_up(d_hid, 128)
    dp_out = _round_up(d_out, 128)

    x_bytes = jnp.dtype(mxu_dtype).itemsize
    vmem_limit = _vmem_limit_bytes()

    # Resident weights/biases (BlockSpec still double-buffers constant-index blocks)
    # and per-row cost of the batch tile + f32 intermediates (z1, h, h_cast, z2).
    resident = 2 * ((dp_in * dp_hid + dp_hid * dp_out) * x_bytes + (dp_hid + dp_out) * 4)
    per_row = 2 * dp_in * x_bytes + 2 * dp_out * 4 + dp_hid * (8 + x_bytes) + dp_out * 4
    avail = max(vmem_limit - resident, 0) * 3 // 4
    tm_fit = max(8, (avail // max(per_row, 1)) // 8 * 8)

    n8 = _round_up(n, 8)
    # >=2 grid steps when the batch allows, so "parallel" can split across v7x's 2 TCs.
    tm = max(8, min(tm_max, tm_fit, _round_up(_cdiv(n8, 2), 8)))
    # TODO(synk): if resident weights alone exceed the VMEM budget (very large hidden
    # dims on v7x's 64 MiB VMEM), add an "arbitrary" grid axis over dp_hid with a VMEM
    # accumulator instead of keeping W1/W2 fully resident.
    n_p = _round_up(n, tm)

    x_p = _pad2d(xf, n_p, dp_in, mxu_dtype)
    w1_p = _pad2d(w1, dp_in, dp_hid, mxu_dtype)
    w2_p = _pad2d(w2, dp_hid, dp_out, mxu_dtype)
    b1_p = _pad2d(b1[None, :], 1, dp_hid, jnp.float32)
    b2_p = _pad2d(b2[None, :], 1, dp_out, jnp.float32)

    flops = 2 * n_p * (dp_in * dp_hid + dp_hid * dp_out)
    transcendentals = n_p * (dp_hid + dp_out)            # one tanh per matmul output elem
    bytes_accessed = (
        n_p * dp_in * x_bytes
        + (dp_in * dp_hid + dp_hid * dp_out) * x_bytes
        + (dp_hid + dp_out) * 4
        + n_p * dp_out * 4
    )

    out_p = pl.pallas_call(
        mlp_kernel,
        out_shape=jax.ShapeDtypeStruct((n_p, dp_out), jnp.float32),
        grid=(n_p // tm,),
        in_specs=[
            pl.BlockSpec((tm, dp_in), lambda i: (i, 0)),       # batch tile of X
            pl.BlockSpec((dp_in, dp_hid), lambda i: (0, 0)),   # W1 (resident)
            pl.BlockSpec((1, dp_hid), lambda i: (0, 0)),       # b1 (resident)
            pl.BlockSpec((dp_hid, dp_out), lambda i: (0, 0)),  # W2 (resident)
            pl.BlockSpec((1, dp_out), lambda i: (0, 0)),       # b2 (resident)
        ],
        out_specs=pl.BlockSpec((tm, dp_out), lambda i: (i, 0)),
        compiler_params=pltpu.CompilerParams(
            dimension_semantics=("parallel",),                 # megacore split on v7x
            vmem_limit_bytes=vmem_limit,                       # per-generation budget
        ),
        cost_estimate=pl.CostEstimate(
            flops=int(flops),
            transcendentals=int(transcendentals),
            bytes_accessed=int(bytes_accessed),
        ),
    )(x_p, w1_p, b1_p, w2_p, b2_p)

    if n_p == n and dp_out == d_out:
        return out_p
    return out_p[:n, :d_out]


def reference_forward(x, wih, who, *, alpha, epsilon, gamma, beta):
    """Pure-JAX reference mirroring the PyTorch module (exact sigmoid)."""
    bmean = jnp.mean(x, axis=0)
    bvar = jnp.var(x, axis=0, ddof=1)
    x_mb = x - bmean / jnp.sqrt(bvar + epsilon)
    x_n = gamma * x_mb + beta
    sig = lambda z: 1.0 / (1.0 + jnp.exp(-alpha * z))
    y2 = sig(x_n @ wih)
    return sig(y2 @ who)


if __name__ == "__main__":
    # Deterministic synthetic parameters / inputs (no checkpoint, no I/O).
    batch, input_dim, hidden_dim, output_dim = 8, 16, 32, 8
    alpha, epsilon, gamma, beta = 1.5, 1e-5, 0.9, 0.1

    key = jax.random.PRNGKey(0)
    kx, kwih, kwho = jax.random.split(key, 3)
    x = jax.random.normal(kx, (batch, input_dim), dtype=jnp.float32)
    wih = jax.random.normal(kwih, (input_dim, hidden_dim), dtype=jnp.float32)
    who = jax.random.normal(kwho, (hidden_dim, output_dim), dtype=jnp.float32)

    ref = reference_forward(
        x, wih, who, alpha=alpha, epsilon=epsilon, gamma=gamma, beta=beta
    )

    # Default (fast) path: bf16 MXU operands, f32 accumulation / elementwise.
    fwd_bf16 = jax.jit(functools.partial(
        mlp_forward, alpha=alpha, epsilon=epsilon, gamma=gamma, beta=beta,
        mxu_dtype=jnp.bfloat16))
    out = jax.block_until_ready(fwd_bf16(x, wih, who))
    assert out.shape == (batch, output_dim)
    # Tolerance accounts for bf16 rounding of the MXU operands.
    assert jnp.allclose(out, ref, atol=2e-2, rtol=2e-2), "bf16-MXU mismatch vs reference"

    # Full-precision path (exact module numerics up to the tanh-form sigmoid fold).
    fwd_f32 = jax.jit(functools.partial(
        mlp_forward, alpha=alpha, epsilon=epsilon, gamma=gamma, beta=beta,
        mxu_dtype=jnp.float32))
    out_f32 = jax.block_until_ready(fwd_f32(x, wih, who))
    assert jnp.allclose(out_f32, ref, atol=1e-3, rtol=1e-3), "f32 mismatch vs reference"

    print("KERNEL_OK")
</pallas_src>

<mosaic_0001>
module attributes {stable_mosaic.version = 11 : i64} {
  func.func @mlp_kernel(%arg0: i32, %arg1: memref<8x128xbf16, #tpu.memory_space<vmem>>, %arg2: memref<128x128xbf16, #tpu.memory_space<vmem>>, %arg3: memref<1x128xf32, #tpu.memory_space<vmem>>, %arg4: memref<128x128xbf16, #tpu.memory_space<vmem>>, %arg5: memref<1x128xf32, #tpu.memory_space<vmem>>, %arg6: memref<8x128xf32, #tpu.memory_space<vmem>>) attributes {dimension_semantics = [#tpu.dimension_semantics<parallel>], iteration_bounds = array<i64: 1>, scalar_prefetch = 0 : i64, scratch_operands = 0 : i64, tpu.core_type = #tpu.core_type<tc>, window_params = [{transform_indices = @transform_0, window_bounds = array<i64: 8, 128>}, {pipeline_mode = #tpu.pipeline_mode<synchronous>, transform_indices = @transform_1, window_bounds = array<i64: 128, 128>}, {pipeline_mode = #tpu.pipeline_mode<synchronous>, transform_indices = @transform_2, window_bounds = array<i64: 1, 128>}, {pipeline_mode = #tpu.pipeline_mode<synchronous>, transform_indices = @transform_3, window_bounds = array<i64: 128, 128>}, {pipeline_mode = #tpu.pipeline_mode<synchronous>, transform_indices = @transform_4, window_bounds = array<i64: 1, 128>}, {transform_indices = @transform_5, window_bounds = array<i64: 8, 128>}]} {
    %c0 = arith.constant 0 : index
    %c0_0 = arith.constant 0 : index
    %0 = vector.load %arg1[%c0, %c0_0] : memref<8x128xbf16, #tpu.memory_space<vmem>>, vector<8x128xbf16>
    %c0_1 = arith.constant 0 : index
    %c0_2 = arith.constant 0 : index
    %1 = vector.load %arg2[%c0_1, %c0_2] : memref<128x128xbf16, #tpu.memory_space<vmem>>, vector<128x128xbf16>
    %cst = arith.constant dense<0.000000e+00> : vector<8x128xf32>
    %2 = tpu.matmul %0, %1, %cst {dimension_numbers = #tpu.dot_dimension_numbers<[1], [0], [0], [1], [0, 0, 1, 1], [], []>} : vector<8x128xbf16>, vector<128x128xbf16>, vector<8x128xf32> -> vector<8x128xf32>
    %c0_3 = arith.constant 0 : index
    %c0_4 = arith.constant 0 : index
    %3 = vector.load %arg3[%c0_3, %c0_4] : memref<1x128xf32, #tpu.memory_space<vmem>>, vector<1x128xf32>
    %4 = vector.broadcast %3 : vector<1x128xf32> to vector<8x128xf32>
    %5 = arith.addf %2, %4 : vector<8x128xf32>
    %6 = math.tanh %5 : vector<8x128xf32>
    %7 = arith.truncf %6 : vector<8x128xf32> to vector<8x128xbf16>
    %c0_5 = arith.constant 0 : index
    %c0_6 = arith.constant 0 : index
    %8 = vector.load %arg4[%c0_5, %c0_6] : memref<128x128xbf16, #tpu.memory_space<vmem>>, vector<128x128xbf16>
    %cst_7 = arith.constant dense<0.000000e+00> : vector<8x128xf32>
    %9 = tpu.matmul %7, %8, %cst_7 {dimension_numbers = #tpu.dot_dimension_numbers<[1], [0], [0], [1], [0, 0, 1, 1], [], []>} : vector<8x128xbf16>, vector<128x128xbf16>, vector<8x128xf32> -> vector<8x128xf32>
    %c0_8 = arith.constant 0 : index
    %c0_9 = arith.constant 0 : index
    %10 = vector.load %arg5[%c0_8, %c0_9] : memref<1x128xf32, #tpu.memory_space<vmem>>, vector<1x128xf32>
    %11 = vector.broadcast %10 : vector<1x128xf32> to vector<8x128xf32>
    %12 = arith.addf %9, %11 : vector<8x128xf32>
    %13 = math.tanh %12 : vector<8x128xf32>
    %cst_10 = arith.constant 5.000000e-01 : f32
    %14 = vector.broadcast %cst_10 : f32 to vector<8x128xf32>
    %15 = arith.mulf %14, %13 : vector<8x128xf32>
    %cst_11 = arith.constant 5.000000e-01 : f32
    %16 = vector.broadcast %cst_11 : f32 to vector<8x128xf32>
    %17 = arith.addf %15, %16 : vector<8x128xf32>
    %c0_12 = arith.constant 0 : index
    %c0_13 = arith.constant 0 : index
    %18 = vector.load %arg6[%c0_12, %c0_13] : memref<8x128xf32, #tpu.memory_space<vmem>>, vector<8x128xf32>
    tpu.vector_store %arg6[%c0_12, %c0_13], %17 {strides = array<i32>} : memref<8x128xf32, #tpu.memory_space<vmem>>, vector<8x128xf32>,
    return
  }
  func.func @transform_0(%arg0: i32) -> (i32, i32) {
    %c0_i32 = arith.constant 0 : i32
    %c0_i32_0 = arith.constant 0 : i32
    return %arg0, %c0_i32 : i32, i32
  }
  func.func @transform_1(%arg0: i32) -> (i32, i32) {
    %c0_i32 = arith.constant 0 : i32
    %c0_i32_0 = arith.constant 0 : i32
    %c0_i32_1 = arith.constant 0 : i32
    return %c0_i32, %c0_i32_0 : i32, i32
  }
  func.func @transform_2(%arg0: i32) -> (i32, i32) {
    %c0_i32 = arith.constant 0 : i32
    %c0_i32_0 = arith.constant 0 : i32
    %c0_i32_1 = arith.constant 0 : i32
    return %c0_i32, %c0_i32_0 : i32, i32
  }
  func.func @transform_3(%arg0: i32) -> (i32, i32) {
    %c0_i32 = arith.constant 0 : i32
    %c0_i32_0 = arith.constant 0 : i32
    %c0_i32_1 = arith.constant 0 : i32
    return %c0_i32, %c0_i32_0 : i32, i32
  }
  func.func @transform_4(%arg0: i32) -> (i32, i32) {
    %c0_i32 = arith.constant 0 : i32
    %c0_i32_0 = arith.constant 0 : i32
    %c0_i32_1 = arith.constant 0 : i32
    return %c0_i32, %c0_i32_0 : i32, i32
  }
  func.func @transform_5(%arg0: i32) -> (i32, i32) {
    %c0_i32 = arith.constant 0 : i32
    %c0_i32_0 = arith.constant 0 : i32
    return %arg0, %c0_i32 : i32, i32
  }
}

</mosaic_0001>

<bundles_post_ra>
// kernel: mlp_forward.1
= control target key start
LH: loop header
LB: loop body
LE: loop exit
PB: predicated region body
PF: predicated region fallthrough
CT: control target
= control target key end

     0   :  { %v386_v1 = vmov 0.0   ;;  %vm387_vm0 = vmmov 0   ;;  %s479_s0 = inlined_call_operand.vmem [shape: bf16[8,128], index: 0, kind: input, shape index: {}]   ;;  %s480_s1 = inlined_call_operand.vmem [shape: bf16[128,128], index: 1, kind: input, shape index: {}]   ;;  %s481_s2 = inlined_call_operand.vmem [shape: f32[1,128], index: 2, kind: input, shape index: {}]   ;;  %s482_s3 = inlined_call_operand.vmem [shape: bf16[128,128], index: 3, kind: input, shape index: {}]   ;;  %s483_s4 = inlined_call_operand.vmem [shape: f32[1,128], index: 4, kind: input, shape index: {}]   ;;  %s484_s5 = inlined_call_operand.hbm [shape: f32[8,128], index: 5, kind: output, shape index: {}]  }
   0x1   :  { %v344_v0 = vld [vmem:[%s480_s1 + $0x38] sm:$0xff]   ;;  %301 = vmatprep.subr.bf16.mxu0 %v386_v1  ;;  %321 = vmatprep.subr.bf16.mxu1 %v386_v1  ;;  %v345_v2 = vld [vmem:[%s480_s1 + $0x30] sm:$0xff]   ;;  %v346_v3 = vld [vmem:[%s480_s1 + $0x28] sm:$0xff]  }
   0x2   :  { %302 = vmatpush3.bf16.msra.mxu0 %v344_v0  ;;  %317 = vmatprep.mubr.msk.bf16.mxu0 %vm387_vm0, %v386_v1  ;;  %v352_v4 = vld [vmem:[%s482_s3 + $0x38] sm:$0xff]   ;;  %v347_v5 = vld [vmem:[%s480_s1 + $0x20] sm:$0xff]   ;;  %v353_v6 = vld [vmem:[%s482_s3 + $0x30] sm:$0xff]  }
   0x3   :  { %303 = vmatprep.subr.bf16.mxu0 %v386_v1  ;;  %337 = vmatprep.mubr.msk.bf16.mxu1 %vm387_vm0, %v386_v1  ;;  %v348_v7 = vld [vmem:[%s480_s1 + $0x18] sm:$0xff]   ;;  %v354_v8 = vld [vmem:[%s482_s3 + $0x28] sm:$0xff]  }
   0x4   :  { %322 = vmatpush3.bf16.msra.mxu1 %v352_v4 }
   0x5   :  { %323 = vmatprep.subr.bf16.mxu1 %v386_v1 }
   0x6   :  { %304 = vmatpush3.bf16.msra.mxu0 %v345_v2 }
   0x7   :  { %305 = vmatprep.subr.bf16.mxu0 %v386_v1 }
   0x8   :  { %324 = vmatpush3.bf16.msra.mxu1 %v353_v6 }
   0xa   :  { %306 = vmatpush3.bf16.msra.mxu0 %v346_v3 }
   0xb   :  { %307 = vmatprep.subr.bf16.mxu0 %v386_v1 }
   0xe   :  { %308 = vmatpush3.bf16.msra.mxu0 %v347_v5 }
   0xf   :  { %309 = vmatprep.subr.bf16.mxu0 %v386_v1 }
  0x10   :  { %10 = vsyncpa [#allocation3], 0  ;;  %325 = vmatprep.subr.bf16.mxu1 %v386_v1  ;;  %v349_v9 = vld [vmem:[%s480_s1 + $0x10] sm:$0xff]   ;;  %v350_v10 = vld [vmem:[%s480_s1 + $0x8] sm:$0xff]  }
  0x11   :  { %326 = vmatpush3.bf16.msra.mxu1 %v354_v8  ;;  %v351_v11 = vld [vmem:[%s480_s1] sm:$0xff]   ;;  %v356_v14 = vld [vmem:[%s482_s3 + $0x18] sm:$0xff]   ;;  %v357_v15 = vld [vmem:[%s482_s3 + $0x10] sm:$0xff]  }
  0x12   :  { %310 = vmatpush3.bf16.msra.mxu0 %v348_v7  ;;  %327 = vmatprep.subr.bf16.mxu1 %v386_v1  ;;  %v22_v12 = vld [vmem:[%s479_s0] sm:$0xf]  ;;  %v358_v16 = vld [vmem:[%s482_s3 + $0x8] sm:$0xff]  }
  0x13   :  { %311 = vmatprep.subr.bf16.mxu0 %v386_v1  ;;  %v355_v13 = vld [vmem:[%s482_s3 + $0x20] sm:$0xff]  }
  0x14   :  { %v359_v17 = vld [vmem:[%s482_s3] sm:$0xff]  }
  0x15   :  { %328 = vmatpush3.bf16.msra.mxu1 %v355_v13  ;;  %v265_v18 = vld [vmem:[%s481_s2] ss:$0 sm:$0xff]  ;;  %s388_s2 = smov [#allocation2]  }
  0x16   :  { %312 = vmatpush3.bf16.msra.mxu0 %v349_v9  ;;  %329 = vmatprep.subr.bf16.mxu1 %v386_v1  ;;  %v274_v26 = vld [vmem:[%s483_s4] ss:$0 sm:$0xff]  ;;  %s257_s3 = sshll.u32 %s388_s2, 4  ;;  %s258_s3 = int_to_ptr.vmem [resolvable:$true] %s257_s3 }
  0x17   :  { %313 = vmatprep.subr.bf16.mxu0 %v386_v1  ;;  %s364_s29 = scalar_lea.vmem %s258_s3, 128  ;;  %p369_p1 = scmp.lt.s32.totalorder %s258_s3, %s258_s3 }
  0x18   :  { %p365_p0 = scmp.ne.s32.totalorder %s258_s3, %s364_s29  ;;  %p370_p2 = scmp.lt.s32.totalorder %s364_s29, %s364_s29 }
  0x19   :  { %330 = vmatpush3.bf16.msra.mxu1 %v356_v14 }
  0x1a   :  { %314 = vmatpush3.bf16.msra.mxu0 %v350_v10  ;;  %331 = vmatprep.subr.bf16.mxu1 %v386_v1  ;;  %p371_p3 = por %p370_p2, %p369_p1 }
  0x1b   :  { %315 = vmatprep.subr.bf16.mxu0 %v386_v1 }
  0x1c   :  { %p372_p4 = pnand %p371_p3, %p365_p0 }
  0x1d   :  { %332 = vmatpush3.bf16.msra.mxu1 %v357_v15 }
  0x1e   :  { %316 = vmatpush3.bf16.msra.mxu0 %v351_v11  ;;  %333 = vmatprep.subr.bf16.mxu1 %v386_v1 }
  0x21   :  { %318 = vmatmul.mubr.bf16.vlgmr.msra.gmra.mxu0 %v22_v12  ;;  %334 = vmatpush3.bf16.msra.mxu1 %v358_v16 }
  0x22   :  { %335 = vmatprep.subr.bf16.mxu1 %v386_v1 }
  0x25   :  { %336 = vmatpush3.bf16.msra.mxu1 %v359_v17 }
  0xe1   :  { %v128_v19 = vpop.f32.mrf.mxu0 }
  0xe2   :  { %v129_v20 = vadd.f32 %v265_v18, %v128_v19 }
  0xe3   :  { %v319_v21 = vpop.f32.mrf.mxu0 }
  0xe4   :  { %360 = vtanh.f32 %v129_v20 }
  0xe5   :  { %v131_v22 = vpop.f32.mrf.mxu0 }
  0xe7   :  { %v320_v23 = vpop.f32.mrf.mxu0 }
  0xf1   :  { %v361_v24 = vpop.eup %360 }
  0xf2   :  { %v135_v25 = vpack.c.bf16 %v361_v24, %v361_v24 }
  0xf4   :  { %338 = vmatmul.mubr.bf16.vlgmr.msra.gmra.mxu1 %v135_v25 }
 0x1b4   :  { %v241_v27 = vpop.f32.mrf.mxu1 }
 0x1b5   :  { %v242_v28 = vadd.f32 %v274_v26, %v241_v27 }
 0x1b6   :  { %v339_v29 = vpop.f32.mrf.mxu1 }
 0x1b7   :  { %362 = vtanh.f32 %v242_v28 }
 0x1b8   :  { %v244_v30 = vpop.f32.mrf.mxu1 }
 0x1ba   :  { %v340_v31 = vpop.f32.mrf.mxu1 }
 0x1c4   :  { %v363_v32 = vpop.eup %362 }
 0x1c5   :  { %v248_v33 = vmul.f32 0.5, %v363_v32 }
 0x1c7   :  { %v249_v34 = vadd.f32 0.5, %v248_v33 }
 0x1c9   :  { %250 = vst [vmem:[#allocation2] sm:$0xff] %v249_v34 }
 0x1ca   :  { %375 = shalt.err (!%p372_p4)
}
 0x1cb   :  { %260 = dma.vmem_to_hbm [thread:$0]  %s258_s3, 128, %s484_s5, [#allocation3]  }
 0x1cc   :  { %384 = dma.done.wait [#allocation3], 128  }
 0x1cd   :  { %385 = vsyncadd [#allocation3], 4294967168 }
 0x1ce   :  { %264 = vsyncpa [#allocation3], 1 }

</bundles_post_ra>
